<compile_context>
chip_gen: v6e
topology: v6e:2x2x1
jax: 0.10.0
libtpu: 0.0.40
codegen_flags: <defaults>
</compile_context>

<pallas_src>
import functools

import jax
import jax.numpy as jnp
from jax.experimental import pallas as pl
from jax.experimental.pallas import tpu as pltpu


def _round_up(x, m):
    return ((x + m - 1) // m) * m


def _block_vmem_bytes(shape, dtype, buffers):
    # VMEM tiles are padded to (8, 128) in the last two dims.
    rows = _round_up(shape[-2], 8)
    cols = _round_up(shape[-1], 128)
    return buffers * rows * cols * jnp.dtype(dtype).itemsize


def meta_linear_kernel(x_ref, w_ref, b_ref, o_ref):
    # y = x @ W^T + b ; W is pre-transposed to (in, out) outside the kernel.
    x = x_ref[...].astype(w_ref.dtype)  # no-op for f32 weights; bf16 option gated in prep
    acc = jnp.dot(x, w_ref[...], preferred_element_type=jnp.float32)
    o_ref[...] = (acc + b_ref[...].astype(jnp.float32)).astype(o_ref.dtype)


def prepare_meta_linear_params(weight, bias, *, dtype=None):
    """One-time parameter prep (call once when params are created, NOT per
    forward): transpose the PyTorch-layout (out, in) weight to (in, out).
    No padding is applied — full-dim blocks are exempt from the (8,128) rule.
    Pass dtype=jnp.bfloat16 to store the weight in bf16 (2-3x MXU / 2x DMA win)
    when accuracy tolerances allow."""
    weight = jnp.asarray(weight)
    if dtype is not None:
        weight = weight.astype(dtype)
    w_t = weight.T                                # (in_features, out_features)
    b_2d = jnp.asarray(bias).reshape(1, -1)       # (1, out_features)
    return w_t, b_2d


@functools.partial(jax.jit, static_argnames=("block_batch", "block_out"))
def meta_linear_forward(x, w_t, b_2d, *, block_batch=512, block_out=512):
    """x: (B, in_features); w_t/b_2d from prepare_meta_linear_params.
    Returns (B, out_features), identical math to F.linear(x, W, b)."""
    B, in_f = x.shape
    in_f_w, out_f = w_t.shape
    assert in_f == in_f_w, (in_f, in_f_w)

    # ---- Batch tile: multiple of 8 sublanes, capped by block_batch, and split
    # so the batch grid has >= 2 steps (v7x dual-TC sharding + DMA overlap).
    if B <= 8:
        tm = B                                    # block == full dim (exempt)
    else:
        tm = min(_round_up(block_batch, 8), _round_up(B, 8))
        if pl.cdiv(B, tm) < 2:
            tm = max(8, _round_up(pl.cdiv(B, 2), 8))

    # ---- Out tile: whole out_features when it fits (block == full dim, masked
    # store beats write inflation + slice for tiny heads); else 128-multiple slab.
    if out_f <= max(block_out, 128):
        tn = out_f
    else:
        tn = _round_up(min(block_out, out_f), 128)

    grid = (pl.cdiv(B, tm), pl.cdiv(out_f, tn))   # N innermost: x tile resident over j
    n_resident = grid[1] == 1                     # weight/bias resident across batch

    # Single-buffer the resident weight/bias once the block is big enough for
    # the saved VMEM to matter (keeps the common tiny-layer path on defaults).
    w_block_bytes = _block_vmem_bytes((in_f, tn), w_t.dtype, 1)
    single_buffer = n_resident and w_block_bytes >= (1 << 20)
    if single_buffer:
        w_spec = pl.BlockSpec((in_f, tn), lambda i, j: (0, j),
                              pipeline_mode=pl.Buffered(1))
        b_spec = pl.BlockSpec((1, tn), lambda i, j: (0, j),
                              pipeline_mode=pl.Buffered(1))
    else:
        w_spec = pl.BlockSpec((in_f, tn), lambda i, j: (0, j))
        b_spec = pl.BlockSpec((1, tn), lambda i, j: (0, j))

    wb_bufs = 1 if single_buffer else 2
    vmem_bytes = (
        _block_vmem_bytes((tm, in_f), x.dtype, 2)           # x tiles (double-buffered)
        + _block_vmem_bytes((tm, tn), x.dtype, 2)           # out tiles
        + _block_vmem_bytes((in_f, tn), w_t.dtype, wb_bufs) # weight slab(s)
        + _block_vmem_bytes((1, tn), b_2d.dtype, wb_bufs)   # bias slab(s)
    )
    vmem_limit = min(int(vmem_bytes * 1.5) + (4 << 20), 128 * 1024 * 1024)

    cost = pl.CostEstimate(
        flops=2 * B * in_f * out_f,
        bytes_accessed=(x.size * x.dtype.itemsize
                        + w_t.size * w_t.dtype.itemsize
                        + b_2d.size * b_2d.dtype.itemsize
                        + B * out_f * x.dtype.itemsize),
        transcendentals=0,
    )

    return pl.pallas_call(
        meta_linear_kernel,
        out_shape=jax.ShapeDtypeStruct((B, out_f), x.dtype),
        grid_spec=pltpu.PrefetchScalarGridSpec(
            num_scalar_prefetch=0,
            grid=grid,
            in_specs=[
                pl.BlockSpec((tm, in_f), lambda i, j: (i, 0)),  # x: pipelined over batch
                w_spec,                                          # weight: resident / streamed
                b_spec,                                          # bias
            ],
            out_specs=pl.BlockSpec((tm, tn), lambda i, j: (i, j)),
        ),
        compiler_params=pltpu.CompilerParams(
            dimension_semantics=("parallel", "parallel"),
            vmem_limit_bytes=vmem_limit,
        ),
        cost_estimate=cost,
    )(x, w_t, b_2d)


if __name__ == "__main__":
    # Small shapes consistent with MetaLinear used as a CIFAR ResNet classifier head.
    batch, in_features, out_features = 256, 64, 10

    key = jax.random.PRNGKey(0)
    kx, kw, kb = jax.random.split(key, 3)

    # nn.Linear-style deterministic init: U(-1/sqrt(in), 1/sqrt(in)).
    bound = 1.0 / (in_features ** 0.5)
    x = jax.random.normal(kx, (batch, in_features), jnp.float32)
    w = jax.random.uniform(kw, (out_features, in_features), jnp.float32,
                           minval=-bound, maxval=bound)
    b = jax.random.uniform(kb, (out_features,), jnp.float32,
                           minval=-bound, maxval=bound)

    # One-time param prep (transpose only; no padding) — out of the per-call path.
    w_t, b_2d = prepare_meta_linear_params(w, b)

    out = jax.block_until_ready(meta_linear_forward(x, w_t, b_2d))
    ref = jnp.matmul(x, w.T, precision=jax.lax.Precision.HIGHEST) + b
    assert out.shape == (batch, out_features)
    assert jnp.allclose(out, ref, atol=1e-4, rtol=1e-4), \
        float(jnp.max(jnp.abs(out - ref)))

    # Ragged batch (not a multiple of the batch tile) exercises the no-pad /
    # masked partial-tile path.
    x2 = x[:100]
    out2 = jax.block_until_ready(meta_linear_forward(x2, w_t, b_2d))
    ref2 = jnp.matmul(x2, w.T, precision=jax.lax.Precision.HIGHEST) + b
    assert out2.shape == (100, out_features)
    assert jnp.allclose(out2, ref2, atol=1e-4, rtol=1e-4)

    # TODO(synk): MetaModule's named_params/update_params/set_param/copy machinery
    # is host-side parameter bookkeeping with no kernel equivalent; only forward()
    # is implemented here.
    print("KERNEL_OK")
</pallas_src>

<mosaic_0001>
module attributes {stable_mosaic.version = 11 : i64} {
  func.func @meta_linear_kernel(%arg0: i32, %arg1: i32, %arg2: memref<128x64xf32, #tpu.memory_space<vmem>>, %arg3: memref<64x10xf32, #tpu.memory_space<vmem>>, %arg4: memref<1x10xf32, #tpu.memory_space<vmem>>, %arg5: memref<128x10xf32, #tpu.memory_space<vmem>>) attributes {dimension_semantics = [#tpu.dimension_semantics<parallel>, #tpu.dimension_semantics<parallel>], iteration_bounds = array<i64: 2, 1>, scalar_prefetch = 0 : i64, scratch_operands = 0 : i64, tpu.core_type = #tpu.core_type<tc>, window_params = [{transform_indices = @transform_0, window_bounds = array<i64: 128, 64>}, {transform_indices = @transform_1, window_bounds = array<i64: 64, 10>}, {transform_indices = @transform_2, window_bounds = array<i64: 1, 10>}, {transform_indices = @transform_3, window_bounds = array<i64: 128, 10>}]} {
    %c0 = arith.constant 0 : index
    %c0_0 = arith.constant 0 : index
    %0 = vector.load %arg2[%c0, %c0_0] : memref<128x64xf32, #tpu.memory_space<vmem>>, vector<128x64xf32>
    %c0_1 = arith.constant 0 : index
    %c0_2 = arith.constant 0 : index
    %1 = vector.load %arg3[%c0_1, %c0_2] : memref<64x10xf32, #tpu.memory_space<vmem>>, vector<64x10xf32>
    %cst = arith.constant dense<0.000000e+00> : vector<128x10xf32>
    %2 = tpu.matmul %0, %1, %cst {dimension_numbers = #tpu.dot_dimension_numbers<[1], [0], [0], [1], [0, 0, 1, 1], [], []>} : vector<128x64xf32>, vector<64x10xf32>, vector<128x10xf32> -> vector<128x10xf32>
    %c0_3 = arith.constant 0 : index
    %c0_4 = arith.constant 0 : index
    %3 = vector.load %arg4[%c0_3, %c0_4] : memref<1x10xf32, #tpu.memory_space<vmem>>, vector<1x10xf32>
    %4 = vector.broadcast %3 : vector<1x10xf32> to vector<128x10xf32>
    %5 = arith.addf %2, %4 : vector<128x10xf32>
    %c0_5 = arith.constant 0 : index
    %c0_6 = arith.constant 0 : index
    %6 = vector.load %arg5[%c0_5, %c0_6] : memref<128x10xf32, #tpu.memory_space<vmem>>, vector<128x10xf32>
    tpu.vector_store %arg5[%c0_5, %c0_6], %5 {strides = array<i32>} : memref<128x10xf32, #tpu.memory_space<vmem>>, vector<128x10xf32>,
    return
  }
  func.func @transform_0(%arg0: i32, %arg1: i32) -> (i32, i32) {
    %c0_i32 = arith.constant 0 : i32
    %c0_i32_0 = arith.constant 0 : i32
    return %arg0, %c0_i32 : i32, i32
  }
  func.func @transform_1(%arg0: i32, %arg1: i32) -> (i32, i32) {
    %c0_i32 = arith.constant 0 : i32
    %c0_i32_0 = arith.constant 0 : i32
    return %c0_i32, %arg1 : i32, i32
  }
  func.func @transform_2(%arg0: i32, %arg1: i32) -> (i32, i32) {
    %c0_i32 = arith.constant 0 : i32
    %c0_i32_0 = arith.constant 0 : i32
    return %c0_i32, %arg1 : i32, i32
  }
  func.func @transform_3(%arg0: i32, %arg1: i32) -> (i32, i32) {
    %c0_i32 = arith.constant 0 : i32
    return %arg0, %arg1 : i32, i32
  }
}

</mosaic_0001>

<bundles_post_ra>
// kernel: meta_linear_forward.1
= control target key start
LH: loop header
LB: loop body
LE: loop exit
PB: predicated region body
PF: predicated region fallthrough
CT: control target
= control target key end

     0   :  { %s747_s12 = smov 0   ;;  %s749_s13 = smov 0   ;;  %s882_s0 = inlined_call_operand.vmem [shape: f32[256,64], index: 0, kind: input, shape index: {}]   ;;  %s883_s1 = inlined_call_operand.vmem [shape: f32[64,10], index: 1, kind: input, shape index: {}]   ;;  %s884_s2 = inlined_call_operand.vmem [shape: f32[1,10], index: 2, kind: input, shape index: {}]   ;;  %s885_s3 = inlined_call_operand.vmem [shape: f32[256,10], index: 3, kind: output, shape index: {}]  }
   0x1   :  { %s751_s14 = smov 0  }
   0x2 LB: > { %s25_s15 = sadd.s32 1, %s721_s13  ;;  %p575_p0 = scmp.ge.s32.totalorder %s725_s14, 1  ;;  %s725_s14 = sphi %s751_s14, %s13_s14   ;;  %s721_s13 = sphi %s749_s13, %s887_s13   ;;  %s717_s12 = sphi %s747_s12, %s886_s12  }
   0x3   : > { %p27_p1 = scmp.ge.s32.totalorder %s25_s15, 2  ;;  %p169_p2 = scmp.lt.s32.totalorder %s725_s14, 3 }
   0x5   : > { %s889_s15 = smov (%p27_p1, %s25_s15), 0  ;;  %p170_p3 = pnand %p575_p0, %p169_p2 }
   0x6   : > { %s576_s20 = sshll.u32 (!%p170_p3), %s717_s12, 4 }
   0x7   : > { %173 = sbr.rel (%p170_p3) target bundleno = 240 (0xf0), region = 32  ;;  %p204_p4 = scmp.lt.s32.totalorder (!%p170_p3), %s576_s20, 31 }
   0xc   : > { %v248_v0 = vld [vmem:[%s883_s1 + $0x38] sm:$0xff]  ;;  %v247_v1 = vld [vmem:[%s883_s1 + $0x30] sm:$0xff]  ;;  %v246_v2 = vld [vmem:[%s883_s1 + $0x28] sm:$0xff]  ;;  %s891_s20 = smov (!%p204_p4, %s576_s20), 31  ;;  %vm256_vm0 = vcmask 523264   ;;  %vm450_vm1 = vcmask 80896  }
   0xd   : > { %623 = vmatprep.subr.mxu0 %v248_v0  ;;  %663 = vmatprep.subr.mxu1 %v248_v0  ;;  %v245_v3 = vld [vmem:[%s883_s1 + $0x20] sm:$0xff]  ;;  %v244_v4 = vld [vmem:[%s883_s1 + $0x18] sm:$0xff]  ;;  %v243_v5 = vld [vmem:[%s883_s1 + $0x10] sm:$0xff]  ;;  %s577_s29 = sshll.u32 %s891_s20, 3 }
   0xe   : > { %624 = vmatpush3.msra.mxu0 %v248_v0  ;;  %671 = vmatpush3.msra.mxu1 %v248_v0  ;;  %v242_v6 = vld [vmem:[%s883_s1 + $0x8] sm:$0xff]  ;;  %s794_s7 = scalar_lea.vmem %s882_s0, %s577_s29  ;;  %v241_v7 = vld [vmem:[%s883_s1] sm:$0xff]  ;;  %s839_s17 = scalar_lea.vmem %s885_s3, %s577_s29 }
   0xf   : > { %625 = vmatprep.subr.mxu0 %v247_v1  ;;  %664 = vmatprep.subr.mxu1 %v247_v1  ;;  %v225_v8 = vld [vmem:[%s794_s7] sm:$0xff]  ;;  %v226_v10 = vld [vmem:[%s794_s7 + $0x8] sm:$0xff]  ;;  %v227_v12 = vld [vmem:[%s794_s7 + $0x10] sm:$0xff] }
  0x10   : > { %626 = vmatpush3.msra.mxu0 %v247_v1  ;;  %672 = vmatpush3.msra.mxu1 %v247_v1  ;;  %v233_v9 = vld [vmem:[%s794_s7 + $0x40] sm:$0xff]  ;;  %v234_v11 = vld [vmem:[%s794_s7 + $0x48] sm:$0xff]  ;;  %v235_v13 = vld [vmem:[%s794_s7 + $0x50] sm:$0xff] }
  0x11   : > { %627 = vmatprep.subr.mxu0 %v246_v2  ;;  %665 = vmatprep.subr.mxu1 %v246_v2  ;;  %v228_v14 = vld [vmem:[%s794_s7 + $0x18] sm:$0xff]  ;;  %v229_v16 = vld [vmem:[%s794_s7 + $0x20] sm:$0xff]  ;;  %v230_v18 = vld [vmem:[%s794_s7 + $0x28] sm:$0xff] }
  0x12   : > { %628 = vmatpush3.msra.mxu0 %v246_v2  ;;  %673 = vmatpush3.msra.mxu1 %v246_v2  ;;  %v236_v15 = vld [vmem:[%s794_s7 + $0x58] sm:$0xff]  ;;  %v237_v17 = vld [vmem:[%s794_s7 + $0x60] sm:$0xff]  ;;  %v238_v19 = vld [vmem:[%s794_s7 + $0x68] sm:$0xff] }
  0x13   : > { %629 = vmatprep.subr.mxu0 %v245_v3  ;;  %666 = vmatprep.subr.mxu1 %v245_v3  ;;  %v231_v20 = vld [vmem:[%s794_s7 + $0x30] sm:$0xff]  ;;  %v232_v22 = vld [vmem:[%s794_s7 + $0x38] sm:$0xff]  ;;  %v580_v24 = vld [vmem:[%s884_s2] ss:$0 sm:$0xff] }
  0x14   : > { %630 = vmatpush3.msra.mxu0 %v245_v3  ;;  %674 = vmatpush3.msra.mxu1 %v245_v3  ;;  %v239_v21 = vld [vmem:[%s794_s7 + $0x70] sm:$0xff]  ;;  %v240_v23 = vld [vmem:[%s794_s7 + $0x78] sm:$0xff] }
  0x15   : > { %631 = vmatprep.subr.mxu0 %v244_v4  ;;  %667 = vmatprep.subr.mxu1 %v244_v4 }
  0x16   : > { %632 = vmatpush3.msra.mxu0 %v244_v4  ;;  %675 = vmatpush3.msra.mxu1 %v244_v4 }
  0x17   : > { %633 = vmatprep.subr.mxu0 %v243_v5  ;;  %668 = vmatprep.subr.mxu1 %v243_v5 }
  0x18   : > { %634 = vmatpush3.msra.mxu0 %v243_v5  ;;  %676 = vmatpush3.msra.mxu1 %v243_v5 }
  0x19   : > { %635 = vmatprep.subr.mxu0 %v242_v6  ;;  %669 = vmatprep.subr.mxu1 %v242_v6 }
  0x1a   : > { %636 = vmatpush3.msra.mxu0 %v242_v6  ;;  %677 = vmatpush3.msra.mxu1 %v242_v6 }
  0x1b   : > { %637 = vmatprep.subr.mxu0 %v241_v7  ;;  %670 = vmatprep.subr.mxu1 %v241_v7 }
  0x1c   : > { %638 = vmatpush3.msra.mxu0 %v241_v7  ;;  %678 = vmatpush3.msra.mxu1 %v241_v7 }
  0x1d   : > { %639 = vmatprep.mubr.msk.f32.mxu0 %vm256_vm0, %v225_v8  ;;  %651 = vmatprep.mubr.msk.f32.mxu1 %vm256_vm0, %v233_v9 }
  0x1e   : > { %640 = vmatmul.mubr.msk.f32.vlgmr.msra.gmra.mxu0 %vm256_vm0, %v226_v10  ;;  %652 = vmatmul.mubr.msk.f32.vlgmr.msra.gmra.mxu1 %vm256_vm0, %v234_v11 }
  0x1f   : > { %642 = vmatprep.mubr.msk.f32.mxu0 %vm256_vm0, %v227_v12  ;;  %654 = vmatprep.mubr.msk.f32.mxu1 %vm256_vm0, %v235_v13 }
  0x22   : > { %643 = vmatmul.mubr.msk.f32.gmra.mxu0 %vm256_vm0, %v228_v14  ;;  %655 = vmatmul.mubr.msk.f32.gmra.mxu1 %vm256_vm0, %v236_v15 }
  0x23   : > { %645 = vmatprep.mubr.msk.f32.mxu0 %vm256_vm0, %v229_v16  ;;  %657 = vmatprep.mubr.msk.f32.mxu1 %vm256_vm0, %v237_v17 }
  0x26   : > { %646 = vmatmul.mubr.msk.f32.gmra.mxu0 %vm256_vm0, %v230_v18  ;;  %658 = vmatmul.mubr.msk.f32.gmra.mxu1 %vm256_vm0, %v238_v19 }
  0x27   : > { %648 = vmatprep.mubr.msk.f32.mxu0 %vm256_vm0, %v231_v20  ;;  %660 = vmatprep.mubr.msk.f32.mxu1 %vm256_vm0, %v239_v21 }
  0x2a   : > { %649 = vmatmul.mubr.msk.f32.gmra.mxu0 %vm256_vm0, %v232_v22  ;;  %661 = vmatmul.mubr.msk.f32.gmra.mxu1 %vm256_vm0, %v240_v23 }
  0xde   : > { %v641_v25 = vpop.f32.mrf.mxu0  ;;  %v653_v26 = vpop.f32.mrf.mxu1 }
  0xdf   : > { %v377_v27 = vadd.f32 %v641_v25, %v580_v24  ;;  %v417_v28 = vadd.f32 %v653_v26, %v580_v24 }
  0xe0   : > { %v371_v29 = vpop.f32.mrf.mxu0  ;;  %v411_v30 = vpop.f32.mrf.mxu1 }
  0xe1   : > { %452 = vst.msk [vmem:[%s839_s17 + $0x8] sm:$0xff] %vm450_vm1, %v377_v27  ;;  %460 = vst.msk [vmem:[%s839_s17 + $0x48] sm:$0xff] %vm450_vm1, %v417_v28  ;;  %v372_v31 = vadd.f32 %v580_v24, %v371_v29  ;;  %v412_v32 = vadd.f32 %v580_v24, %v411_v30 }
  0xe2   : > { %v644_v33 = vpop.f32.mrf.mxu0  ;;  %v656_v34 = vpop.f32.mrf.mxu1 }
  0xe3   : > { %451 = vst.msk [vmem:[%s839_s17] sm:$0xff] %vm450_vm1, %v372_v31  ;;  %459 = vst.msk [vmem:[%s839_s17 + $0x40] sm:$0xff] %vm450_vm1, %v412_v32  ;;  %v387_v35 = vadd.f32 %v644_v33, %v580_v24  ;;  %v427_v36 = vadd.f32 %v656_v34, %v580_v24 }
  0xe4   : > { %v381_v37 = vpop.f32.mrf.mxu0  ;;  %v421_v38 = vpop.f32.mrf.mxu1 }
  0xe5   : > { %454 = vst.msk [vmem:[%s839_s17 + $0x18] sm:$0xff] %vm450_vm1, %v387_v35  ;;  %462 = vst.msk [vmem:[%s839_s17 + $0x58] sm:$0xff] %vm450_vm1, %v427_v36  ;;  %v382_v39 = vadd.f32 %v580_v24, %v381_v37  ;;  %v422_v40 = vadd.f32 %v580_v24, %v421_v38 }
  0xe6   : > { %v647_v41 = vpop.f32.mrf.mxu0  ;;  %v659_v42 = vpop.f32.mrf.mxu1 }
  0xe7   : > { %453 = vst.msk [vmem:[%s839_s17 + $0x10] sm:$0xff] %vm450_vm1, %v382_v39  ;;  %461 = vst.msk [vmem:[%s839_s17 + $0x50] sm:$0xff] %vm450_vm1, %v422_v40  ;;  %v397_v43 = vadd.f32 %v647_v41, %v580_v24  ;;  %v437_v44 = vadd.f32 %v659_v42, %v580_v24 }
  0xe8   : > { %v391_v45 = vpop.f32.mrf.mxu0  ;;  %v431_v46 = vpop.f32.mrf.mxu1 }
  0xe9   : > { %456 = vst.msk [vmem:[%s839_s17 + $0x28] sm:$0xff] %vm450_vm1, %v397_v43  ;;  %464 = vst.msk [vmem:[%s839_s17 + $0x68] sm:$0xff] %vm450_vm1, %v437_v44  ;;  %v392_v47 = vadd.f32 %v580_v24, %v391_v45  ;;  %v432_v48 = vadd.f32 %v580_v24, %v431_v46 }
  0xea   : > { %v650_v49 = vpop.f32.mrf.mxu0  ;;  %v662_v50 = vpop.f32.mrf.mxu1 }
  0xeb   : > { %455 = vst.msk [vmem:[%s839_s17 + $0x20] sm:$0xff] %vm450_vm1, %v392_v47  ;;  %463 = vst.msk [vmem:[%s839_s17 + $0x60] sm:$0xff] %vm450_vm1, %v432_v48  ;;  %v407_v51 = vadd.f32 %v650_v49, %v580_v24  ;;  %v447_v52 = vadd.f32 %v662_v50, %v580_v24 }
  0xec   : > { %v401_v53 = vpop.f32.mrf.mxu0  ;;  %v441_v54 = vpop.f32.mrf.mxu1 }
  0xed   : > { %458 = vst.msk [vmem:[%s839_s17 + $0x38] sm:$0xff] %vm450_vm1, %v407_v51  ;;  %466 = vst.msk [vmem:[%s839_s17 + $0x78] sm:$0xff] %vm450_vm1, %v447_v52  ;;  %v402_v55 = vadd.f32 %v580_v24, %v401_v53  ;;  %v442_v56 = vadd.f32 %v580_v24, %v441_v54 }
  0xef   : > { %457 = vst.msk [vmem:[%s839_s17 + $0x30] sm:$0xff] %vm450_vm1, %v402_v55  ;;  %465 = vst.msk [vmem:[%s839_s17 + $0x70] sm:$0xff] %vm450_vm1, %v442_v56 }
  0xf0 PF: > { %s13_s14 = sadd.s32 1, %s725_s14   ;;  %s886_s12 = smov %s721_s13 }
  0xf1   : > { %p10_p5 = scmp.ge.s32.totalorder %s13_s14, 4   ;;  %s887_s13 = smov %s889_s15 }
  0xf3   :  { %12 = sbr.rel (!%p10_p5) target bundleno = 2 (0x2), region = 68 }

</bundles_post_ra>
